<compile_context>
chip_gen: v5e
topology: v5e:2x2
jax: 0.10.0
libtpu: 0.0.40
codegen_flags: <defaults>
</compile_context>

<pallas_src>
import functools

import jax
import jax.numpy as jnp
from jax.experimental import pallas as pl
from jax.experimental.pallas import tpu as pltpu


def encoder_layer_kernel(
    x_ref,                       # (bb, S, D)      f32
    qkvw_ref, qkvb_ref,          # (D, 3*H*dk) mm_dtype, (1, 3*H*dk) f32
    ow_ref, ob_ref,              # (H*dk, D) mm_dtype,   (1, D) f32
    g1_ref, be1_ref,             # LayerNorm 1 gamma/beta, (1, D) f32
    w1_ref, c1_ref,              # (D, F) mm_dtype, (1, F) f32
    w2_ref, c2_ref,              # (F, D) mm_dtype, (1, D) f32
    g2_ref, be2_ref,             # LayerNorm 2 gamma/beta, (1, D) f32
    o_ref,                       # (bb, S, D)      f32
    *, num_heads, mm_dtype,
):
    bb, S, D = x_ref.shape
    hdk = ow_ref.shape[0]                 # H * dk
    dk = hdk // num_heads
    inv_scale = 1.0 / (float(dk) ** 0.5)

    x3 = x_ref[...]                       # (bb, S, D) f32
    x2 = x3.reshape(bb * S, D)            # flatten tokens -> bigger MXU M tile

    # --- Fused QKV projection: one lane-dense MXU matmul for all heads ---
    qkv = jnp.dot(x2.astype(mm_dtype), qkvw_ref[...],
                  preferred_element_type=jnp.float32) + qkvb_ref[...]   # (bb*S, 3*H*dk) f32
    qkv3 = qkv.reshape(bb, S, 3 * hdk)

    # --- Multi-head attention: batched over batch dim, heads accumulated into
    #     the output projection (no concatenate / no k.T transpose) ---
    attn = jnp.zeros((bb * S, D), jnp.float32)
    for h in range(num_heads):
        q = qkv3[:, :, h * dk:(h + 1) * dk]                 # (bb, S, dk)
        k = qkv3[:, :, hdk + h * dk: hdk + (h + 1) * dk]
        v = qkv3[:, :, 2 * hdk + h * dk: 2 * hdk + (h + 1) * dk]

        s = jnp.einsum('bqd,bkd->bqk',
                       q.astype(mm_dtype), k.astype(mm_dtype),
                       preferred_element_type=jnp.float32) * inv_scale  # (bb, S, S)
        s = s - jnp.max(s, axis=-1, keepdims=True)
        p = jnp.exp(s)
        p = p * pl.reciprocal(jnp.sum(p, axis=-1, keepdims=True), approx=True)

        head = jnp.einsum('bqk,bkd->bqd',
                          p.astype(mm_dtype), v.astype(mm_dtype),
                          preferred_element_type=jnp.float32)           # (bb, S, dk)

        attn = attn + jnp.dot(head.reshape(bb * S, dk).astype(mm_dtype),
                              ow_ref[h * dk:(h + 1) * dk, :],
                              preferred_element_type=jnp.float32)       # (bb*S, D)
    attn = attn + ob_ref[...]

    # --- Residual + LayerNorm 1 (biased variance, eps=1e-5, f32 math) ---
    r1 = x2 + attn
    mu1 = jnp.mean(r1, axis=-1, keepdims=True)
    d1 = r1 - mu1
    var1 = jnp.mean(d1 * d1, axis=-1, keepdims=True)
    ln1 = d1 * jax.lax.rsqrt(var1 + 1e-5) * g1_ref[...] + be1_ref[...]

    # --- Feed-forward: Linear -> ReLU -> Linear ---
    h1 = jnp.dot(ln1.astype(mm_dtype), w1_ref[...],
                 preferred_element_type=jnp.float32) + c1_ref[...]
    h1 = jnp.maximum(h1, 0.0)
    ff = jnp.dot(h1.astype(mm_dtype), w2_ref[...],
                 preferred_element_type=jnp.float32) + c2_ref[...]

    # --- Residual + LayerNorm 2 ---
    r2 = ln1 + ff
    mu2 = jnp.mean(r2, axis=-1, keepdims=True)
    d2 = r2 - mu2
    var2 = jnp.mean(d2 * d2, axis=-1, keepdims=True)
    out = d2 * jax.lax.rsqrt(var2 + 1e-5) * g2_ref[...] + be2_ref[...]

    o_ref[...] = out.reshape(bb, S, D)


def _pick_block_b(B, cap=8):
    for bb in range(min(B, cap), 0, -1):
        if B % bb == 0:
            return bb
    return 1


def transformer_encoder_layer(x, params, *, matmul_dtype=jnp.float32, block_b=None):
    """x: (B, S, D) float32. params: dict of per-head-layout parameters."""
    B, S, D = x.shape
    H, _, dk = params["qw"].shape
    hdk = H * dk

    def fuse(w):  # (H, D, dk) -> (D, H*dk): per-head weights as column blocks
        return jnp.transpose(w, (1, 0, 2)).reshape(D, hdk)

    qkvw = jnp.concatenate([fuse(params["qw"]), fuse(params["kw"]), fuse(params["vw"])],
                           axis=1)                                     # (D, 3*H*dk)
    qkvb = jnp.concatenate([params["qb"].reshape(-1), params["kb"].reshape(-1),
                            params["vb"].reshape(-1)])[None, :]        # (1, 3*H*dk)

    # Weights that only feed the MXU are cast once here (halves DMA bytes / VMEM
    # when matmul_dtype=bf16). Biases & LN params stay f32 (VPU math is f32).
    qkvw = qkvw.astype(matmul_dtype)
    ow = params["ow"].astype(matmul_dtype)                             # (H*dk, D)
    w1 = params["w1"].astype(matmul_dtype)                             # (D, F)
    w2 = params["w2"].astype(matmul_dtype)                             # (F, D)

    ob = params["ob"][None, :]
    g1, be1 = params["g1"][None, :], params["be1"][None, :]
    c1, c2 = params["c1"][None, :], params["c2"][None, :]
    g2, be2 = params["g2"][None, :], params["be2"][None, :]

    if block_b is None:
        block_b = _pick_block_b(B)
    assert B % block_b == 0

    args = (x, qkvw, qkvb, ow, ob, g1, be1, w1, c1, w2, c2, g2, be2)

    def full_spec(a):
        nd = a.ndim
        return pl.BlockSpec(a.shape, lambda i, _nd=nd: (0,) * _nd)

    in_specs = [pl.BlockSpec((block_b, S, D), lambda i: (i, 0, 0))]
    in_specs += [full_spec(a) for a in args[1:]]

    kernel = functools.partial(encoder_layer_kernel, num_heads=H, mm_dtype=matmul_dtype)

    return pl.pallas_call(
        kernel,
        out_shape=jax.ShapeDtypeStruct((B, S, D), jnp.float32),
        grid_spec=pltpu.PrefetchScalarGridSpec(
            num_scalar_prefetch=0,
            grid=(B // block_b,),
            in_specs=in_specs,
            out_specs=pl.BlockSpec((block_b, S, D), lambda i: (i, 0, 0)),
        ),
        compiler_params=pltpu.CompilerParams(
            dimension_semantics=("parallel",),
            vmem_limit_bytes=64 * 1024 * 1024,
        ),
    )(*args)


def init_params(key, dim_model, num_heads, dim_ff):
    dk = dim_model // num_heads
    ks = jax.random.split(key, 12)
    sc = 0.05
    f32 = jnp.float32
    return {
        "qw": jax.random.normal(ks[0], (num_heads, dim_model, dk), f32) * sc,
        "qb": jax.random.normal(ks[1], (num_heads, dk), f32) * sc,
        "kw": jax.random.normal(ks[2], (num_heads, dim_model, dk), f32) * sc,
        "kb": jax.random.normal(ks[3], (num_heads, dk), f32) * sc,
        "vw": jax.random.normal(ks[4], (num_heads, dim_model, dk), f32) * sc,
        "vb": jax.random.normal(ks[5], (num_heads, dk), f32) * sc,
        "ow": jax.random.normal(ks[6], (num_heads * dk, dim_model), f32) * sc,
        "ob": jax.random.normal(ks[7], (dim_model,), f32) * sc,
        "g1": jnp.ones((dim_model,), f32),
        "be1": jnp.zeros((dim_model,), f32),
        "w1": jax.random.normal(ks[8], (dim_model, dim_ff), f32) * sc,
        "c1": jax.random.normal(ks[9], (dim_ff,), f32) * sc,
        "w2": jax.random.normal(ks[10], (dim_ff, dim_model), f32) * sc,
        "c2": jax.random.normal(ks[11], (dim_model,), f32) * sc,
        "g2": jnp.ones((dim_model,), f32),
        "be2": jnp.zeros((dim_model,), f32),
    }


def reference(x, p):
    """Pure-JAX reference replicating the PyTorch forward (eval mode)."""
    def ln(z, g, b):
        mu = z.mean(-1, keepdims=True)
        var = ((z - mu) ** 2).mean(-1, keepdims=True)
        return (z - mu) / jnp.sqrt(var + 1e-5) * g + b

    heads = []
    num_heads = p["qw"].shape[0]
    for h in range(num_heads):
        q = x @ p["qw"][h] + p["qb"][h]
        k = x @ p["kw"][h] + p["kb"][h]
        v = x @ p["vw"][h] + p["vb"][h]
        s = (q @ jnp.swapaxes(k, 1, 2)) / (q.shape[-1] ** 0.5)
        heads.append(jax.nn.softmax(s, axis=-1) @ v)
    attn = jnp.concatenate(heads, axis=-1) @ p["ow"] + p["ob"]
    r1 = ln(x + attn, p["g1"], p["be1"])
    ff = jnp.maximum(r1 @ p["w1"] + p["c1"], 0.0) @ p["w2"] + p["c2"]
    return ln(r1 + ff, p["g2"], p["be2"])


if __name__ == "__main__":
    B, S, dim_model, num_heads, dim_ff = 2, 8, 32, 4, 64
    key = jax.random.PRNGKey(0)
    kx, kp = jax.random.split(key)
    x = jax.random.normal(kx, (B, S, dim_model), jnp.float32)
    params = init_params(kp, dim_model, num_heads, dim_ff)

    ref = reference(x, params)

    # f32 matmul path (exact-structure check; approx reciprocal -> slightly loose tol)
    out_f32 = jax.block_until_ready(
        transformer_encoder_layer(x, params, matmul_dtype=jnp.float32))
    assert out_f32.shape == (B, S, dim_model)
    err_f32 = float(jnp.max(jnp.abs(out_f32 - ref)))
    assert err_f32 < 5e-3, f"f32 path mismatch vs reference: {err_f32}"

    # bf16 matmul-operand path (the v6e/v7x-preferred mode); f32 softmax/LN math
    out_bf16 = jax.block_until_ready(
        transformer_encoder_layer(x, params, matmul_dtype=jnp.bfloat16))
    err_bf16 = float(jnp.max(jnp.abs(out_bf16 - ref)))
    assert err_bf16 < 5e-2, f"bf16 path mismatch vs reference: {err_bf16}"

    print("KERNEL_OK")
</pallas_src>

<mosaic_0001>
module attributes {stable_mosaic.version = 11 : i64} {
  func.func @encoder_layer_kernel(%arg0: i32, %arg1: memref<2x8x32xf32, #tpu.memory_space<vmem>>, %arg2: memref<32x96xf32, #tpu.memory_space<vmem>>, %arg3: memref<1x96xf32, #tpu.memory_space<vmem>>, %arg4: memref<32x32xf32, #tpu.memory_space<vmem>>, %arg5: memref<1x32xf32, #tpu.memory_space<vmem>>, %arg6: memref<1x32xf32, #tpu.memory_space<vmem>>, %arg7: memref<1x32xf32, #tpu.memory_space<vmem>>, %arg8: memref<32x64xf32, #tpu.memory_space<vmem>>, %arg9: memref<1x64xf32, #tpu.memory_space<vmem>>, %arg10: memref<64x32xf32, #tpu.memory_space<vmem>>, %arg11: memref<1x32xf32, #tpu.memory_space<vmem>>, %arg12: memref<1x32xf32, #tpu.memory_space<vmem>>, %arg13: memref<1x32xf32, #tpu.memory_space<vmem>>, %arg14: memref<2x8x32xf32, #tpu.memory_space<vmem>>) attributes {dimension_semantics = [#tpu.dimension_semantics<parallel>], iteration_bounds = array<i64: 1>, scalar_prefetch = 0 : i64, scratch_operands = 0 : i64, tpu.core_type = #tpu.core_type<tc>, window_params = [{transform_indices = @transform_0, window_bounds = array<i64: 2, 8, 32>}, {pipeline_mode = #tpu.pipeline_mode<synchronous>, transform_indices = @transform_1, window_bounds = array<i64: 32, 96>}, {pipeline_mode = #tpu.pipeline_mode<synchronous>, transform_indices = @transform_2, window_bounds = array<i64: 1, 96>}, {pipeline_mode = #tpu.pipeline_mode<synchronous>, transform_indices = @transform_3, window_bounds = array<i64: 32, 32>}, {pipeline_mode = #tpu.pipeline_mode<synchronous>, transform_indices = @transform_4, window_bounds = array<i64: 1, 32>}, {pipeline_mode = #tpu.pipeline_mode<synchronous>, transform_indices = @transform_5, window_bounds = array<i64: 1, 32>}, {pipeline_mode = #tpu.pipeline_mode<synchronous>, transform_indices = @transform_6, window_bounds = array<i64: 1, 32>}, {pipeline_mode = #tpu.pipeline_mode<synchronous>, transform_indices = @transform_7, window_bounds = array<i64: 32, 64>}, {pipeline_mode = #tpu.pipeline_mode<synchronous>, transform_indices = @transform_8, window_bounds = array<i64: 1, 64>}, {pipeline_mode = #tpu.pipeline_mode<synchronous>, transform_indices = @transform_9, window_bounds = array<i64: 64, 32>}, {pipeline_mode = #tpu.pipeline_mode<synchronous>, transform_indices = @transform_10, window_bounds = array<i64: 1, 32>}, {pipeline_mode = #tpu.pipeline_mode<synchronous>, transform_indices = @transform_11, window_bounds = array<i64: 1, 32>}, {pipeline_mode = #tpu.pipeline_mode<synchronous>, transform_indices = @transform_12, window_bounds = array<i64: 1, 32>}, {transform_indices = @transform_13, window_bounds = array<i64: 2, 8, 32>}]} {
    %c0 = arith.constant 0 : index
    %c0_0 = arith.constant 0 : index
    %c0_1 = arith.constant 0 : index
    %0 = vector.load %arg1[%c0, %c0_0, %c0_1] : memref<2x8x32xf32, #tpu.memory_space<vmem>>, vector<2x8x32xf32>
    %1 = vector.shape_cast %0 : vector<2x8x32xf32> to vector<16x32xf32>
    %c0_2 = arith.constant 0 : index
    %c0_3 = arith.constant 0 : index
    %2 = vector.load %arg2[%c0_2, %c0_3] : memref<32x96xf32, #tpu.memory_space<vmem>>, vector<32x96xf32>
    %cst = arith.constant dense<0.000000e+00> : vector<16x96xf32>
    %3 = tpu.matmul %1, %2, %cst {dimension_numbers = #tpu.dot_dimension_numbers<[1], [0], [0], [1], [0, 0, 1, 1], [], []>} : vector<16x32xf32>, vector<32x96xf32>, vector<16x96xf32> -> vector<16x96xf32>
    %c0_4 = arith.constant 0 : index
    %c0_5 = arith.constant 0 : index
    %4 = vector.load %arg3[%c0_4, %c0_5] : memref<1x96xf32, #tpu.memory_space<vmem>>, vector<1x96xf32>
    %5 = vector.broadcast %4 : vector<1x96xf32> to vector<16x96xf32>
    %6 = arith.addf %3, %5 : vector<16x96xf32>
    %7 = vector.shape_cast %6 : vector<16x96xf32> to vector<2x8x96xf32>
    %cst_6 = arith.constant 0.000000e+00 : f32
    %8 = vector.broadcast %cst_6 : f32 to vector<16x32xf32>
    %9 = vector.extract_strided_slice %7 {offsets = [0, 0, 0], sizes = [2, 8, 8], strides = [1, 1, 1]} : vector<2x8x96xf32> to vector<2x8x8xf32>
    %10 = vector.extract_strided_slice %7 {offsets = [0, 0, 32], sizes = [2, 8, 8], strides = [1, 1, 1]} : vector<2x8x96xf32> to vector<2x8x8xf32>
    %11 = vector.extract_strided_slice %7 {offsets = [0, 0, 64], sizes = [2, 8, 8], strides = [1, 1, 1]} : vector<2x8x96xf32> to vector<2x8x8xf32>
    "tpu.trace_start"() <{level = 10 : i32, message = "bqd,bkd->bqk"}> : () -> ()
    %cst_7 = arith.constant dense<0.000000e+00> : vector<2x8x8xf32>
    %12 = tpu.matmul %9, %10, %cst_7 {dimension_numbers = #tpu.dot_dimension_numbers<[2], [2], [1], [1], [0, 0, 0, 1, 1, 1], [0], [0]>} : vector<2x8x8xf32>, vector<2x8x8xf32>, vector<2x8x8xf32> -> vector<2x8x8xf32>
    "tpu.trace_stop"() : () -> ()
    %cst_8 = arith.constant 0.353553385 : f32
    %13 = vector.broadcast %cst_8 : f32 to vector<2x8x8xf32>
    %14 = arith.mulf %12, %13 : vector<2x8x8xf32>
    %cst_9 = arith.constant dense<0xFF800000> : vector<2x8xf32>
    %15 = vector.multi_reduction <maximumf>, %14, %cst_9 [2] : vector<2x8x8xf32> to vector<2x8xf32>
    %16 = vector.shape_cast %15 : vector<2x8xf32> to vector<2x8x1xf32>
    %17 = vector.broadcast %16 : vector<2x8x1xf32> to vector<2x8x8xf32>
    %18 = arith.subf %14, %17 : vector<2x8x8xf32>
    %19 = math.exp %18 : vector<2x8x8xf32>
    %cst_10 = arith.constant dense<0.000000e+00> : vector<2x8xf32>
    %20 = vector.multi_reduction <add>, %19, %cst_10 [2] : vector<2x8x8xf32> to vector<2x8xf32>
    %21 = vector.shape_cast %20 : vector<2x8xf32> to vector<2x8x1xf32>
    %22 = tpu.reciprocal %21 {approx = true} : vector<2x8x1xf32> -> vector<2x8x1xf32>
    %23 = vector.broadcast %22 : vector<2x8x1xf32> to vector<2x8x8xf32>
    %24 = arith.mulf %19, %23 : vector<2x8x8xf32>
    "tpu.trace_start"() <{level = 10 : i32, message = "bqk,bkd->bqd"}> : () -> ()
    %cst_11 = arith.constant dense<0.000000e+00> : vector<2x8x8xf32>
    %25 = tpu.matmul %24, %11, %cst_11 {dimension_numbers = #tpu.dot_dimension_numbers<[2], [1], [1], [2], [0, 0, 0, 1, 1, 2], [0], [0]>} : vector<2x8x8xf32>, vector<2x8x8xf32>, vector<2x8x8xf32> -> vector<2x8x8xf32>
    "tpu.trace_stop"() : () -> ()
    %26 = vector.shape_cast %25 : vector<2x8x8xf32> to vector<16x8xf32>
    %c0_12 = arith.constant 0 : index
    %c0_13 = arith.constant 0 : index
    %27 = vector.load %arg4[%c0_12, %c0_13] : memref<32x32xf32, #tpu.memory_space<vmem>>, vector<8x32xf32>
    %cst_14 = arith.constant dense<0.000000e+00> : vector<16x32xf32>
    %28 = tpu.matmul %26, %27, %cst_14 {dimension_numbers = #tpu.dot_dimension_numbers<[1], [0], [0], [1], [0, 0, 1, 1], [], []>} : vector<16x8xf32>, vector<8x32xf32>, vector<16x32xf32> -> vector<16x32xf32>
    %29 = arith.addf %8, %28 : vector<16x32xf32>
    %30 = vector.extract_strided_slice %7 {offsets = [0, 0, 8], sizes = [2, 8, 8], strides = [1, 1, 1]} : vector<2x8x96xf32> to vector<2x8x8xf32>
    %31 = vector.extract_strided_slice %7 {offsets = [0, 0, 40], sizes = [2, 8, 8], strides = [1, 1, 1]} : vector<2x8x96xf32> to vector<2x8x8xf32>
    %32 = vector.extract_strided_slice %7 {offsets = [0, 0, 72], sizes = [2, 8, 8], strides = [1, 1, 1]} : vector<2x8x96xf32> to vector<2x8x8xf32>
    "tpu.trace_start"() <{level = 10 : i32, message = "bqd,bkd->bqk"}> : () -> ()
    %cst_15 = arith.constant dense<0.000000e+00> : vector<2x8x8xf32>
    %33 = tpu.matmul %30, %31, %cst_15 {dimension_numbers = #tpu.dot_dimension_numbers<[2], [2], [1], [1], [0, 0, 0, 1, 1, 1], [0], [0]>} : vector<2x8x8xf32>, vector<2x8x8xf32>, vector<2x8x8xf32> -> vector<2x8x8xf32>
    "tpu.trace_stop"() : () -> ()
    %cst_16 = arith.constant 0.353553385 : f32
    %34 = vector.broadcast %cst_16 : f32 to vector<2x8x8xf32>
    %35 = arith.mulf %33, %34 : vector<2x8x8xf32>
    %cst_17 = arith.constant dense<0xFF800000> : vector<2x8xf32>
    %36 = vector.multi_reduction <maximumf>, %35, %cst_17 [2] : vector<2x8x8xf32> to vector<2x8xf32>
    %37 = vector.shape_cast %36 : vector<2x8xf32> to vector<2x8x1xf32>
    %38 = vector.broadcast %37 : vector<2x8x1xf32> to vector<2x8x8xf32>
    %39 = arith.subf %35, %38 : vector<2x8x8xf32>
    %40 = math.exp %39 : vector<2x8x8xf32>
    %cst_18 = arith.constant dense<0.000000e+00> : vector<2x8xf32>
    %41 = vector.multi_reduction <add>, %40, %cst_18 [2] : vector<2x8x8xf32> to vector<2x8xf32>
    %42 = vector.shape_cast %41 : vector<2x8xf32> to vector<2x8x1xf32>
    %43 = tpu.reciprocal %42 {approx = true} : vector<2x8x1xf32> -> vector<2x8x1xf32>
    %44 = vector.broadcast %43 : vector<2x8x1xf32> to vector<2x8x8xf32>
    %45 = arith.mulf %40, %44 : vector<2x8x8xf32>
    "tpu.trace_start"() <{level = 10 : i32, message = "bqk,bkd->bqd"}> : () -> ()
    %cst_19 = arith.constant dense<0.000000e+00> : vector<2x8x8xf32>
    %46 = tpu.matmul %45, %32, %cst_19 {dimension_numbers = #tpu.dot_dimension_numbers<[2], [1], [1], [2], [0, 0, 0, 1, 1, 2], [0], [0]>} : vector<2x8x8xf32>, vector<2x8x8xf32>, vector<2x8x8xf32> -> vector<2x8x8xf32>
    "tpu.trace_stop"() : () -> ()
    %47 = vector.shape_cast %46 : vector<2x8x8xf32> to vector<16x8xf32>
    %c8 = arith.constant 8 : index
    %c0_20 = arith.constant 0 : index
    %48 = vector.load %arg4[%c8, %c0_20] : memref<32x32xf32, #tpu.memory_space<vmem>>, vector<8x32xf32>
    %cst_21 = arith.constant dense<0.000000e+00> : vector<16x32xf32>
    %49 = tpu.matmul %47, %48, %cst_21 {dimension_numbers = #tpu.dot_dimension_numbers<[1], [0], [0], [1], [0, 0, 1, 1], [], []>} : vector<16x8xf32>, vector<8x32xf32>, vector<16x32xf32> -> vector<16x32xf32>
    %50 = arith.addf %29, %49 : vector<16x32xf32>
    %51 = vector.extract_strided_slice %7 {offsets = [0, 0, 16], sizes = [2, 8, 8], strides = [1, 1, 1]} : vector<2x8x96xf32> to vector<2x8x8xf32>
    %52 = vector.extract_strided_slice %7 {offsets = [0, 0, 48], sizes = [2, 8, 8], strides = [1, 1, 1]} : vector<2x8x96xf32> to vector<2x8x8xf32>
    %53 = vector.extract_strided_slice %7 {offsets = [0, 0, 80], sizes = [2, 8, 8], strides = [1, 1, 1]} : vector<2x8x96xf32> to vector<2x8x8xf32>
    "tpu.trace_start"() <{level = 10 : i32, message = "bqd,bkd->bqk"}> : () -> ()
    %cst_22 = arith.constant dense<0.000000e+00> : vector<2x8x8xf32>
    %54 = tpu.matmul %51, %52, %cst_22 {dimension_numbers = #tpu.dot_dimension_numbers<[2], [2], [1], [1], [0, 0, 0, 1, 1, 1], [0], [0]>} : vector<2x8x8xf32>, vector<2x8x8xf32>, vector<2x8x8xf32> -> vector<2x8x8xf32>
    "tpu.trace_stop"() : () -> ()
    %cst_23 = arith.constant 0.353553385 : f32
    %55 = vector.broadcast %cst_23 : f32 to vector<2x8x8xf32>
    %56 = arith.mulf %54, %55 : vector<2x8x8xf32>
    %cst_24 = arith.constant dense<0xFF800000> : vector<2x8xf32>
    %57 = vector.multi_reduction <maximumf>, %56, %cst_24 [2] : vector<2x8x8xf32> to vector<2x8xf32>
    %58 = vector.shape_cast %57 : vector<2x8xf32> to vector<2x8x1xf32>
    %59 = vector.broadcast %58 : vector<2x8x1xf32> to vector<2x8x8xf32>
    %60 = arith.subf %56, %59 : vector<2x8x8xf32>
    %61 = math.exp %60 : vector<2x8x8xf32>
    %cst_25 = arith.constant dense<0.000000e+00> : vector<2x8xf32>
    %62 = vector.multi_reduction <add>, %61, %cst_25 [2] : vector<2x8x8xf32> to vector<2x8xf32>
    %63 = vector.shape_cast %62 : vector<2x8xf32> to vector<2x8x1xf32>
    %64 = tpu.reciprocal %63 {approx = true} : vector<2x8x1xf32> -> vector<2x8x1xf32>
    %65 = vector.broadcast %64 : vector<2x8x1xf32> to vector<2x8x8xf32>
    %66 = arith.mulf %61, %65 : vector<2x8x8xf32>
    "tpu.trace_start"() <{level = 10 : i32, message = "bqk,bkd->bqd"}> : () -> ()
    %cst_26 = arith.constant dense<0.000000e+00> : vector<2x8x8xf32>
    %67 = tpu.matmul %66, %53, %cst_26 {dimension_numbers = #tpu.dot_dimension_numbers<[2], [1], [1], [2], [0, 0, 0, 1, 1, 2], [0], [0]>} : vector<2x8x8xf32>, vector<2x8x8xf32>, vector<2x8x8xf32> -> vector<2x8x8xf32>
    "tpu.trace_stop"() : () -> ()
    %68 = vector.shape_cast %67 : vector<2x8x8xf32> to vector<16x8xf32>
    %c16 = arith.constant 16 : index
    %c0_27 = arith.constant 0 : index
    %69 = vector.load %arg4[%c16, %c0_27] : memref<32x32xf32, #tpu.memory_space<vmem>>, vector<8x32xf32>
    %cst_28 = arith.constant dense<0.000000e+00> : vector<16x32xf32>
    %70 = tpu.matmul %68, %69, %cst_28 {dimension_numbers = #tpu.dot_dimension_numbers<[1], [0], [0], [1], [0, 0, 1, 1], [], []>} : vector<16x8xf32>, vector<8x32xf32>, vector<16x32xf32> -> vector<16x32xf32>
    %71 = arith.addf %50, %70 : vector<16x32xf32>
    %72 = vector.extract_strided_slice %7 {offsets = [0, 0, 24], sizes = [2, 8, 8], strides = [1, 1, 1]} : vector<2x8x96xf32> to vector<2x8x8xf32>
    %73 = vector.extract_strided_slice %7 {offsets = [0, 0, 56], sizes = [2, 8, 8], strides = [1, 1, 1]} : vector<2x8x96xf32> to vector<2x8x8xf32>
    %74 = vector.extract_strided_slice %7 {offsets = [0, 0, 88], sizes = [2, 8, 8], strides = [1, 1, 1]} : vector<2x8x96xf32> to vector<2x8x8xf32>
    "tpu.trace_start"() <{level = 10 : i32, message = "bqd,bkd->bqk"}> : () -> ()
    %cst_29 = arith.constant dense<0.000000e+00> : vector<2x8x8xf32>
    %75 = tpu.matmul %72, %73, %cst_29 {dimension_numbers = #tpu.dot_dimension_numbers<[2], [2], [1], [1], [0, 0, 0, 1, 1, 1], [0], [0]>} : vector<2x8x8xf32>, vector<2x8x8xf32>, vector<2x8x8xf32> -> vector<2x8x8xf32>
    "tpu.trace_stop"() : () -> ()
    %cst_30 = arith.constant 0.353553385 : f32
    %76 = vector.broadcast %cst_30 : f32 to vector<2x8x8xf32>
    %77 = arith.mulf %75, %76 : vector<2x8x8xf32>
    %cst_31 = arith.constant dense<0xFF800000> : vector<2x8xf32>
    %78 = vector.multi_reduction <maximumf>, %77, %cst_31 [2] : vector<2x8x8xf32> to vector<2x8xf32>
    %79 = vector.shape_cast %78 : vector<2x8xf32> to vector<2x8x1xf32>
    %80 = vector.broadcast %79 : vector<2x8x1xf32> to vector<2x8x8xf32>
    %81 = arith.subf %77, %80 : vector<2x8x8xf32>
    %82 = math.exp %81 : vector<2x8x8xf32>
    %cst_32 = arith.constant dense<0.000000e+00> : vector<2x8xf32>
    %83 = vector.multi_reduction <add>, %82, %cst_32 [2] : vector<2x8x8xf32> to vector<2x8xf32>
    %84 = vector.shape_cast %83 : vector<2x8xf32> to vector<2x8x1xf32>
    %85 = tpu.reciprocal %84 {approx = true} : vector<2x8x1xf32> -> vector<2x8x1xf32>
    %86 = vector.broadcast %85 : vector<2x8x1xf32> to vector<2x8x8xf32>
    %87 = arith.mulf %82, %86 : vector<2x8x8xf32>
    "tpu.trace_start"() <{level = 10 : i32, message = "bqk,bkd->bqd"}> : () -> ()
    %cst_33 = arith.constant dense<0.000000e+00> : vector<2x8x8xf32>
    %88 = tpu.matmul %87, %74, %cst_33 {dimension_numbers = #tpu.dot_dimension_numbers<[2], [1], [1], [2], [0, 0, 0, 1, 1, 2], [0], [0]>} : vector<2x8x8xf32>, vector<2x8x8xf32>, vector<2x8x8xf32> -> vector<2x8x8xf32>
    "tpu.trace_stop"() : () -> ()
    %89 = vector.shape_cast %88 : vector<2x8x8xf32> to vector<16x8xf32>
    %c24 = arith.constant 24 : index
    %c0_34 = arith.constant 0 : index
    %90 = vector.load %arg4[%c24, %c0_34] : memref<32x32xf32, #tpu.memory_space<vmem>>, vector<8x32xf32>
    %cst_35 = arith.constant dense<0.000000e+00> : vector<16x32xf32>
    %91 = tpu.matmul %89, %90, %cst_35 {dimension_numbers = #tpu.dot_dimension_numbers<[1], [0], [0], [1], [0, 0, 1, 1], [], []>} : vector<16x8xf32>, vector<8x32xf32>, vector<16x32xf32> -> vector<16x32xf32>
    %92 = arith.addf %71, %91 : vector<16x32xf32>
    %c0_36 = arith.constant 0 : index
    %c0_37 = arith.constant 0 : index
    %93 = vector.load %arg5[%c0_36, %c0_37] : memref<1x32xf32, #tpu.memory_space<vmem>>, vector<1x32xf32>
    %94 = vector.broadcast %93 : vector<1x32xf32> to vector<16x32xf32>
    %95 = arith.addf %92, %94 : vector<16x32xf32>
    %96 = arith.addf %1, %95 : vector<16x32xf32>
    %cst_38 = arith.constant dense<0.000000e+00> : vector<16xf32>
    %97 = vector.multi_reduction <add>, %96, %cst_38 [1] : vector<16x32xf32> to vector<16xf32>
    %98 = vector.shape_cast %97 : vector<16xf32> to vector<16x1xf32>
    %cst_39 = arith.constant 3.200000e+01 : f32
    %99 = vector.broadcast %cst_39 : f32 to vector<16x1xf32>
    %100 = arith.divf %98, %99 : vector<16x1xf32>
    %101 = vector.broadcast %100 : vector<16x1xf32> to vector<16x32xf32>
    %102 = arith.subf %96, %101 : vector<16x32xf32>
    %103 = arith.mulf %102, %102 : vector<16x32xf32>
    %cst_40 = arith.constant dense<0.000000e+00> : vector<16xf32>
    %104 = vector.multi_reduction <add>, %103, %cst_40 [1] : vector<16x32xf32> to vector<16xf32>
    %105 = vector.shape_cast %104 : vector<16xf32> to vector<16x1xf32>
    %cst_41 = arith.constant 3.200000e+01 : f32
    %106 = vector.broadcast %cst_41 : f32 to vector<16x1xf32>
    %107 = arith.divf %105, %106 : vector<16x1xf32>
    %cst_42 = arith.constant 9.99999974E-6 : f32
    %108 = vector.broadcast %cst_42 : f32 to vector<16x1xf32>
    %109 = arith.addf %107, %108 : vector<16x1xf32>
    %110 = math.rsqrt %109 : vector<16x1xf32>
    %111 = vector.broadcast %110 : vector<16x1xf32> to vector<16x32xf32>
    %112 = arith.mulf %102, %111 : vector<16x32xf32>
    %c0_43 = arith.constant 0 : index
    %c0_44 = arith.constant 0 : index
    %113 = vector.load %arg6[%c0_43, %c0_44] : memref<1x32xf32, #tpu.memory_space<vmem>>, vector<1x32xf32>
    %114 = vector.broadcast %113 : vector<1x32xf32> to vector<16x32xf32>
    %115 = arith.mulf %112, %114 : vector<16x32xf32>
    %c0_45 = arith.constant 0 : index
    %c0_46 = arith.constant 0 : index
    %116 = vector.load %arg7[%c0_45, %c0_46] : memref<1x32xf32, #tpu.memory_space<vmem>>, vector<1x32xf32>
    %117 = vector.broadcast %116 : vector<1x32xf32> to vector<16x32xf32>
    %118 = arith.addf %115, %117 : vector<16x32xf32>
    %c0_47 = arith.constant 0 : index
    %c0_48 = arith.constant 0 : index
    %119 = vector.load %arg8[%c0_47, %c0_48] : memref<32x64xf32, #tpu.memory_space<vmem>>, vector<32x64xf32>
    %cst_49 = arith.constant dense<0.000000e+00> : vector<16x64xf32>
    %120 = tpu.matmul %118, %119, %cst_49 {dimension_numbers = #tpu.dot_dimension_numbers<[1], [0], [0], [1], [0, 0, 1, 1], [], []>} : vector<16x32xf32>, vector<32x64xf32>, vector<16x64xf32> -> vector<16x64xf32>
    %c0_50 = arith.constant 0 : index
    %c0_51 = arith.constant 0 : index
    %121 = vector.load %arg9[%c0_50, %c0_51] : memref<1x64xf32, #tpu.memory_space<vmem>>, vector<1x64xf32>
    %122 = vector.broadcast %121 : vector<1x64xf32> to vector<16x64xf32>
    %123 = arith.addf %120, %122 : vector<16x64xf32>
    %cst_52 = arith.constant 0.000000e+00 : f32
    %124 = vector.broadcast %cst_52 : f32 to vector<16x64xf32>
    %125 = arith.maximumf %123, %124 : vector<16x64xf32>
    %c0_53 = arith.constant 0 : index
    %c0_54 = arith.constant 0 : index
    %126 = vector.load %arg10[%c0_53, %c0_54] : memref<64x32xf32, #tpu.memory_space<vmem>>, vector<64x32xf32>
    %cst_55 = arith.constant dense<0.000000e+00> : vector<16x32xf32>
    %127 = tpu.matmul %125, %126, %cst_55 {dimension_numbers = #tpu.dot_dimension_numbers<[1], [0], [0], [1], [0, 0, 1, 1], [], []>} : vector<16x64xf32>, vector<64x32xf32>, vector<16x32xf32> -> vector<16x32xf32>
    %c0_56 = arith.constant 0 : index
    %c0_57 = arith.constant 0 : index
    %128 = vector.load %arg11[%c0_56, %c0_57] : memref<1x32xf32, #tpu.memory_space<vmem>>, vector<1x32xf32>
    %129 = vector.broadcast %128 : vector<1x32xf32> to vector<16x32xf32>
    %130 = arith.addf %127, %129 : vector<16x32xf32>
    %131 = arith.addf %118, %130 : vector<16x32xf32>
    %cst_58 = arith.constant dense<0.000000e+00> : vector<16xf32>
    %132 = vector.multi_reduction <add>, %131, %cst_58 [1] : vector<16x32xf32> to vector<16xf32>
    %133 = vector.shape_cast %132 : vector<16xf32> to vector<16x1xf32>
    %cst_59 = arith.constant 3.200000e+01 : f32
    %134 = vector.broadcast %cst_59 : f32 to vector<16x1xf32>
    %135 = arith.divf %133, %134 : vector<16x1xf32>
    %136 = vector.broadcast %135 : vector<16x1xf32> to vector<16x32xf32>
    %137 = arith.subf %131, %136 : vector<16x32xf32>
    %138 = arith.mulf %137, %137 : vector<16x32xf32>
    %cst_60 = arith.constant dense<0.000000e+00> : vector<16xf32>
    %139 = vector.multi_reduction <add>, %138, %cst_60 [1] : vector<16x32xf32> to vector<16xf32>
    %140 = vector.shape_cast %139 : vector<16xf32> to vector<16x1xf32>
    %cst_61 = arith.constant 3.200000e+01 : f32
    %141 = vector.broadcast %cst_61 : f32 to vector<16x1xf32>
    %142 = arith.divf %140, %141 : vector<16x1xf32>
    %cst_62 = arith.constant 9.99999974E-6 : f32
    %143 = vector.broadcast %cst_62 : f32 to vector<16x1xf32>
    %144 = arith.addf %142, %143 : vector<16x1xf32>
    %145 = math.rsqrt %144 : vector<16x1xf32>
    %146 = vector.broadcast %145 : vector<16x1xf32> to vector<16x32xf32>
    %147 = arith.mulf %137, %146 : vector<16x32xf32>
    %c0_63 = arith.constant 0 : index
    %c0_64 = arith.constant 0 : index
    %148 = vector.load %arg12[%c0_63, %c0_64] : memref<1x32xf32, #tpu.memory_space<vmem>>, vector<1x32xf32>
    %149 = vector.broadcast %148 : vector<1x32xf32> to vector<16x32xf32>
    %150 = arith.mulf %147, %149 : vector<16x32xf32>
    %c0_65 = arith.constant 0 : index
    %c0_66 = arith.constant 0 : index
    %151 = vector.load %arg13[%c0_65, %c0_66] : memref<1x32xf32, #tpu.memory_space<vmem>>, vector<1x32xf32>
    %152 = vector.broadcast %151 : vector<1x32xf32> to vector<16x32xf32>
    %153 = arith.addf %150, %152 : vector<16x32xf32>
    %154 = vector.shape_cast %153 : vector<16x32xf32> to vector<2x8x32xf32>
    %c0_67 = arith.constant 0 : index
    %c0_68 = arith.constant 0 : index
    %c0_69 = arith.constant 0 : index
    %155 = vector.load %arg14[%c0_67, %c0_68, %c0_69] : memref<2x8x32xf32, #tpu.memory_space<vmem>>, vector<2x8x32xf32>
    tpu.vector_store %arg14[%c0_67, %c0_68, %c0_69], %154 {strides = array<i32>} : memref<2x8x32xf32, #tpu.memory_space<vmem>>, vector<2x8x32xf32>,
    return
  }
  func.func @transform_0(%arg0: i32) -> (i32, i32, i32) {
    %c0_i32 = arith.constant 0 : i32
    %c0_i32_0 = arith.constant 0 : i32
    %c0_i32_1 = arith.constant 0 : i32
    return %arg0, %c0_i32, %c0_i32_0 : i32, i32, i32
  }
  func.func @transform_1(%arg0: i32) -> (i32, i32) {
    %c0_i32 = arith.constant 0 : i32
    %c0_i32_0 = arith.constant 0 : i32
    %c0_i32_1 = arith.constant 0 : i32
    return %c0_i32, %c0_i32_0 : i32, i32
  }
  func.func @transform_2(%arg0: i32) -> (i32, i32) {
    %c0_i32 = arith.constant 0 : i32
    %c0_i32_0 = arith.constant 0 : i32
    %c0_i32_1 = arith.constant 0 : i32
    return %c0_i32, %c0_i32_0 : i32, i32
  }
  func.func @transform_3(%arg0: i32) -> (i32, i32) {
    %c0_i32 = arith.constant 0 : i32
    %c0_i32_0 = arith.constant 0 : i32
    %c0_i32_1 = arith.constant 0 : i32
    return %c0_i32, %c0_i32_0 : i32, i32
  }
  func.func @transform_4(%arg0: i32) -> (i32, i32) {
    %c0_i32 = arith.constant 0 : i32
    %c0_i32_0 = arith.constant 0 : i32
    %c0_i32_1 = arith.constant 0 : i32
    return %c0_i32, %c0_i32_0 : i32, i32
  }
  func.func @transform_5(%arg0: i32) -> (i32, i32) {
    %c0_i32 = arith.constant 0 : i32
    %c0_i32_0 = arith.constant 0 : i32
    %c0_i32_1 = arith.constant 0 : i32
    return %c0_i32, %c0_i32_0 : i32, i32
  }
  func.func @transform_6(%arg0: i32) -> (i32, i32) {
    %c0_i32 = arith.constant 0 : i32
    %c0_i32_0 = arith.constant 0 : i32
    %c0_i32_1 = arith.constant 0 : i32
    return %c0_i32, %c0_i32_0 : i32, i32
  }
  func.func @transform_7(%arg0: i32) -> (i32, i32) {
    %c0_i32 = arith.constant 0 : i32
    %c0_i32_0 = arith.constant 0 : i32
    %c0_i32_1 = arith.constant 0 : i32
    return %c0_i32, %c0_i32_0 : i32, i32
  }
  func.func @transform_8(%arg0: i32) -> (i32, i32) {
    %c0_i32 = arith.constant 0 : i32
    %c0_i32_0 = arith.constant 0 : i32
    %c0_i32_1 = arith.constant 0 : i32
    return %c0_i32, %c0_i32_0 : i32, i32
  }
  func.func @transform_9(%arg0: i32) -> (i32, i32) {
    %c0_i32 = arith.constant 0 : i32
    %c0_i32_0 = arith.constant 0 : i32
    %c0_i32_1 = arith.constant 0 : i32
    return %c0_i32, %c0_i32_0 : i32, i32
  }
  func.func @transform_10(%arg0: i32) -> (i32, i32) {
    %c0_i32 = arith.constant 0 : i32
    %c0_i32_0 = arith.constant 0 : i32
    %c0_i32_1 = arith.constant 0 : i32
    return %c0_i32, %c0_i32_0 : i32, i32
  }
  func.func @transform_11(%arg0: i32) -> (i32, i32) {
    %c0_i32 = arith.constant 0 : i32
    %c0_i32_0 = arith.constant 0 : i32
    %c0_i32_1 = arith.constant 0 : i32
    return %c0_i32, %c0_i32_0 : i32, i32
  }
  func.func @transform_12(%arg0: i32) -> (i32, i32) {
    %c0_i32 = arith.constant 0 : i32
    %c0_i32_0 = arith.constant 0 : i32
    %c0_i32_1 = arith.constant 0 : i32
    return %c0_i32, %c0_i32_0 : i32, i32
  }
  func.func @transform_13(%arg0: i32) -> (i32, i32, i32) {
    %c0_i32 = arith.constant 0 : i32
    %c0_i32_0 = arith.constant 0 : i32
    %c0_i32_1 = arith.constant 0 : i32
    return %arg0, %c0_i32, %c0_i32_0 : i32, i32, i32
  }
}

</mosaic_0001>

<bundles_post_ra>
// kernel: tpu_custom_call.1
= control target key start
LH: loop header
LB: loop body
LE: loop exit
PB: predicated region body
PF: predicated region fallthrough
CT: control target
= control target key end

     0   :  { %18 = vsyncpa [#allocation3], 0  ;;  %s1445_s0 = inlined_call_operand.hbm [shape: f32[2,8,32], index: 0, kind: input, shape index: {}]   ;;  %s1446_s1 = inlined_call_operand.vmem [shape: f32[32,96], index: 1, kind: input, shape index: {}]   ;;  %s1447_s2 = inlined_call_operand.vmem [shape: f32[1,96], index: 2, kind: input, shape index: {}]   ;;  %s1448_s3 = inlined_call_operand.vmem [shape: f32[32,32], index: 3, kind: input, shape index: {}]   ;;  %s1449_s4 = inlined_call_operand.vmem [shape: f32[1,32], index: 4, kind: input, shape index: {}]   ;;  %s1450_s5 = inlined_call_operand.vmem [shape: f32[1,32], index: 5, kind: input, shape index: {}]   ;;  %s1451_s6 = inlined_call_operand.vmem [shape: f32[1,32], index: 6, kind: input, shape index: {}]   ;;  %s1452_s7 = inlined_call_operand.vmem [shape: f32[32,64], index: 7, kind: input, shape index: {}]   ;;  %s1453_s8 = inlined_call_operand.vmem [shape: f32[1,64], index: 8, kind: input, shape index: {}]   ;;  %s1454_s9 = inlined_call_operand.vmem [shape: f32[64,32], index: 9, kind: input, shape index: {}]   ;;  %s1455_s10 = inlined_call_operand.vmem [shape: f32[1,32], index: 10, kind: input, shape index: {}]   ;;  %s1456_s11 = inlined_call_operand.vmem [shape: f32[1,32], index: 11, kind: input, shape index: {}]   ;;  %s1457_s12 = inlined_call_operand.vmem [shape: f32[1,32], index: 12, kind: input, shape index: {}]   ;;  %s1458_s13 = inlined_call_operand.hbm [shape: f32[2,8,32], index: 13, kind: output, shape index: {}]  }
   0x1   :  { %19 = vsyncpa [#allocation4], 0  ;;  %s24_s27 = sshll.u32 %s1445_s0, 4  ;;  %s1139_s28 = smov [#allocation2]   ;;  %s25_s27 = int_to_ptr.hbm [resolvable:$true] %s24_s27 }
   0x2   :  { %s26_s29 = sshll.u32 %s1139_s28, 4  ;;  %s1140_s30 = smov 128   ;;  %s27_s29 = int_to_ptr.vmem [resolvable:$true] %s26_s29 }
   0x3   :  { %s1141_s14 = smov 8  }
   0x4   :  { %32 = dma.hbm_to_vmem [thread:$0]  %s25_s27, 256, %s27_s29, [#allocation3], %s1140_s30, %s1140_s30, %s1141_s14  }
   0x5   :  { %1135 = dma.done.wait [#allocation3], 256  }
   0x6   :  { %1136 = vsyncadd [#allocation3], 4294967040  ;;  %v66_v0 = vld [vmem:[%s1446_s1 + $0x18] sm:$0xff]  ;;  %v65_v1 = vld [vmem:[%s1446_s1 + $0x10] sm:$0xff]  ;;  %vm71_vm0 = vcmask 261120   ;;  %s1143_s24 = smov 96  }
   0x7   :  { %90 = vmatpush.msra.mxu0 %v66_v0  ;;  %v64_v2 = vld [vmem:[%s1446_s1 + $0x8] sm:$0xff]  ;;  %v63_v3 = vld [vmem:[%s1446_s1] sm:$0xff]  ;;  %s1142_s1 = smov 88   ;;  %s1144_s25 = smov 120   ;;  %vm104_vm1 = vcmask 64512   ;;  %vm874_vm9 = vcmask 523264  }
   0x8   :  { %v1243_v4 = vld [vmem:[#allocation2] sm:$0xff]  ;;  %v1247_v5 = vld [vmem:[#allocation2 + $0x8] sm:$0xff]  ;;  %s1146_s26 = smov 80   ;;  %s1147_s27 = smov 56  }
   0x9   :  { %91 = vmatpush.msra.mxu0 %v65_v1  ;;  %v1037_v6 = vld [vmem:[%s1447_s2] ss:$0 sm:$0xff]  ;;  %s1145_s2 = smov 64   ;;  %s1148_s28 = smov 112   ;;  %v365_v59 = vld [vmem:[%s1448_s3 + $0x8] sm:$0xff] }
   0xa   :  { %s1149_s29 = smov 48   ;;  %s1150_s15 = smov 72   ;;  %v232_v58 = vld [vmem:[%s1448_s3] sm:$0xff] }
   0xb   :  { %92 = vmatpush.msra.mxu0 %v64_v2  ;;  %s1151_s16 = smov 104   ;;  %s1152_s22 = smov 40  }
   0xc   :  { %s970_s20 = sshll.u32 %s1458_s13, 4  ;;  %s971_s20 = int_to_ptr.hbm [resolvable:$true] %s970_s20 }
   0xd   :  { %93 = vmatpush.msra.mxu0 %v63_v3 }
   0xe   :  { %983 = vmatmul.msk.f32.vlgmr.msra.gmra.mxu0 %vm71_vm0, %v1243_v4 }
  0x16   :  { %984 = vmatmul.msk.f32.gmra.mxu0 %vm71_vm0, %v1247_v5 }
  0x8b   :  { %v95_v7 = vpop.f32.mrf.mxu0 }
  0x8c   :  { %v1254_v8 = vadd.f32 %v1037_v6, %v95_v7 }
  0x8e   :  { %235 = vrot.lane.b32.xlu1 %v1254_v8, %s1142_s1  ;;  %102 = vrot.lane.b32.xlu0 %v1254_v8, %s1143_s24 }
  0x93   :  { %v98_v9 = vpop.f32.mrf.mxu0 }
  0x94   :  { %v1258_v10 = vadd.f32 %v1037_v6, %v98_v9 }
  0x96   :  { %233 = vrot.lane.b32.xlu1 %v1254_v8, %s1144_s25  ;;  %130 = vrot.lane.b32.xlu0 %v1258_v10, %s1143_s24 }
  0x9e   :  { %263 = vrot.lane.b32.xlu1 %v1258_v10, %s1142_s1 }
 0x100   :  { %v236_v11 = vpop.permute.xlu1 %235  ;;  %v103_v12 = vpop.permute.xlu0 %102 }
 0x101   :  { %985 = vmatpush.xpose.msk.msrb.mxu0 %vm104_vm1, %v103_v12  ;;  %991 = vmatpush.xpose.msk.msra.mxu1 %vm104_vm1, %v236_v11 }
 0x104   :  { %986 = vmatmul.msk.f32.vlgmr.msrb.gmra.mxu0 %vm104_vm1, %v1254_v8 }
 0x105   :  { %416 = vmatpush.msra.mxu0 %v232_v58 }
 0x108   :  { %v234_v13 = vpop.permute.xlu1 %233  ;;  %v131_v14 = vpop.permute.xlu0 %130 }
 0x109   :  { %987 = vmatpush.xpose.msk.msra.mxu2 %vm104_vm1, %v131_v14  ;;  %992 = vmatmul.msk.f32.vlgmr.msra.gmra.mxu1 %vm104_vm1, %v234_v13 }
 0x10c   :  { %988 = vmatmul.msk.f32.vlgmr.msra.gmra.mxu2 %vm104_vm1, %v1258_v10 }
 0x110   :  { %v264_v15 = vpop.permute.xlu1 %263 }
 0x111   :  { %993 = vmatpush.xpose.msk.msrb.mxu2 %vm104_vm1, %v264_v15 }
 0x115   :  { %387 = vmatpush.msra.mxu2 %v365_v59 }
 0x181   :  { %v126_v16 = vpop.f32.mrf.mxu0 }
 0x182   :  { %v156_v17 = vmul.f32 0.35355338, %v126_v16 }
 0x184   :  { %v158_v18 = vsel %vm104_vm1, %v156_v17, -inf }
 0x185   :  { %159 = vmax.xlane.f32.xlu2 %v158_v18 }
 0x186   :  { %v258_v19 = vpop.f32.mrf.mxu1 }
 0x187   :  { %v289_v20 = vmul.f32 0.35355338, %v258_v19 }
 0x189   :  { %v291_v21 = vsel %vm104_vm1, %v289_v20, -inf }
 0x18a   :  { %292 = vmax.xlane.f32.xlu0 %v291_v21 }
 0x18f   :  { %v153_v22 = vpop.f32.mrf.mxu2 }
 0x190   :  { %v157_v23 = vmul.f32 0.35355338, %v153_v22 }
 0x192   :  { %v161_v24 = vsel %vm104_vm1, %v157_v23, -inf }
 0x193   :  { %162 = vmax.xlane.f32.xlu2 %v161_v24 }
 0x19e   :  { %206 = vrot.lane.b32.xlu0 %v1258_v10, %s1145_s2 }
 0x1a6   :  { %261 = vrot.lane.b32.xlu0 %v1258_v10, %s1144_s25 }
 0x1ab   :  { %180 = vrot.lane.b32.xlu2 %v1254_v8, %s1145_s2 }
 0x1ae   :  { %426 = vrot.lane.b32.xlu0 %v1254_v8, %s1146_s26 }
 0x1b6   :  { %454 = vrot.lane.b32.xlu0 %v1258_v10, %s1146_s26 }
 0x1f8   :  { %v160_v25 = vpop.xlane.xlu2 %159 }
 0x1f9   :  { %v164_v26 = vsub.f32 %v156_v17, %v160_v25 }
 0x1fb   :  { %v166_v27 = vmul.f32 1.442695, %v164_v26 }
 0x1fd   :  { %1045 = vpow2.f32 %v166_v27  ;;  %v293_v28 = vpop.xlane.xlu0 %292 }
 0x1fe   :  { %v297_v29 = vsub.f32 %v289_v20, %v293_v28 }
 0x200   :  { %v299_v30 = vmul.f32 1.442695, %v297_v29 }
 0x202   :  { %1047 = vpow2.f32 %v299_v30 }
 0x203   :  { %v1046_v31 = vpop.eup %1045 }
 0x204   :  { %v170_v32 = vsel %vm104_vm1, %v1046_v31, 0.0 }
 0x205   :  { %171 = vadd.xlane.f32.xlu1 %v170_v32 }
 0x206   :  { %v163_v33 = vpop.xlane.xlu2 %162 }
 0x207   :  { %v165_v34 = vsub.f32 %v157_v23, %v163_v33 }
 0x208   :  { %v1048_v35 = vpop.eup %1047 }
 0x209   :  { %v168_v36 = vmul.f32 1.442695, %v165_v34  ;;  %v303_v37 = vsel %vm104_vm1, %v1048_v35, 0.0  ;;  %v556_v34 = vld [vmem:[%s1448_s3 + $0x10] sm:$0xff] }
 0x20a   :  { %304 = vadd.xlane.f32.xlu2 %v303_v37 }
 0x20b   :  { %1049 = vpow2.f32 %v168_v36 }
 0x20e   :  { %v181_v38 = vpop.permute.xlu2 %180 }
 0x20f   :  { %201 = vmatpush.msra.mxu3 %v181_v38 }
 0x210   :  { %v207_v39 = vpop.permute.xlu0 %206 }
 0x211   :  { %v1050_v40 = vpop.eup %1049  ;;  %227 = vmatpush.msrb.mxu3 %v207_v39 }
 0x212   :  { %v173_v41 = vsel %vm104_vm1, %v1050_v40, 0.0 }
 0x213   :  { %174 = vadd.xlane.f32.xlu2 %v173_v41 }
 0x218   :  { %v262_v42 = vpop.permute.xlu0 %261 }
 0x219   :  { %994 = vmatmul.msk.f32.vlgmr.msrb.gmra.mxu2 %vm104_vm1, %v262_v42 }
 0x21a   :  { %578 = vmatpush.msrb.mxu2 %v556_v34 }
 0x21e   :  { %313 = vrot.lane.b32.xlu1 %v1254_v8, %s1147_s27 }
 0x220   :  { %v427_v51 = vpop.permute.xlu0 %426 }
 0x228   :  { %v455_v12 = vpop.permute.xlu0 %454 }
 0x22b   :  { %424 = vrot.lane.b32.xlu2 %v1254_v8, %s1148_s28 }
 0x278   :  { %v172_v43 = vpop.xlane.xlu1 %171 }
 0x279   :  { %1051 = vrcp.f32 %v172_v43 }
 0x27d   :  { %v305_v44 = vpop.xlane.xlu2 %304 }
 0x27f   :  { %v1052_v45 = vpop.eup %1051 }
 0x280   :  { %v178_v46 = vmul.f32 %v1052_v45, %v1046_v31 }
 0x282   :  { %989 = vmatmul.msk.f32.vlgmr.msra.gmra.mxu3 %vm104_vm1, %v178_v46 }
 0x286   :  { %v175_v47 = vpop.xlane.xlu2 %174 }
 0x287   :  { %1053 = vrcp.f32 %v175_v47 }
 0x288   :  { %1055 = vrcp.f32 %v305_v44 }
 0x28d   :  { %v1054_v48 = vpop.eup %1053 }
 0x28e   :  { %v179_v49 = vmul.f32 %v1054_v48, %v1050_v40  ;;  %v1056_v52 = vpop.eup %1055  ;;  %v425_v56 = vpop.permute.xlu2 %424 }
 0x28f   :  { %v311_v53 = vmul.f32 %v1056_v52, %v1048_v35 }
 0x290   :  { %v314_v50 = vpop.permute.xlu1 %313  ;;  %990 = vmatmul.msk.f32.vlgmr.msrb.gmra.mxu3 %vm104_vm1, %v179_v49 }
 0x291   :  { %334 = vmatpush.msra.mxu3 %v314_v50 }
 0x293   :  { %1001 = vmatpush.xpose.msk.msrb.mxu3 %vm104_vm1, %v427_v51 }
 0x298   :  { %995 = vmatmul.msk.f32.vlgmr.msra.gmra.mxu3 %vm104_vm1, %v311_v53 }
 0x29c   :  { %v286_v54 = vpop.f32.mrf.mxu2 }
 0x29d   :  { %v290_v55 = vmul.f32 0.35355338, %v286_v54 }
 0x29f   :  { %v294_v57 = vsel %vm104_vm1, %v290_v55, -inf }
 0x2a0   :  { %295 = vmax.xlane.f32.xlu1 %v294_v57  ;;  %1002 = vmatmul.msk.f32.vlgmr.msrb.gmra.mxu3 %vm104_vm1, %v425_v56 }
 0x2b9   :  { %339 = vrot.lane.b32.xlu1 %v1258_v10, %s1147_s27 }
 0x2c1   :  { %504 = vrot.lane.b32.xlu1 %v1254_v8, %s1149_s29 }
 0x2c9   :  { %618 = vrot.lane.b32.xlu1 %v1258_v10, %s1150_s15 }
 0x2d1   :  { %616 = vrot.lane.b32.xlu1 %v1258_v10, %s1151_s16 }
 0x305   :  { %v203_v60 = vpop.f32.mrf.mxu3 }
 0x306   :  { %999 = vmatmul.msk.f32.vlgmr.msra.gmra.mxu0 %vm104_vm1, %v203_v60 }
 0x313   :  { %v229_v61 = vpop.f32.mrf.mxu3  ;;  %v296_v62 = vpop.xlane.xlu1 %295 }
 0x314   :  { %v298_v63 = vsub.f32 %v290_v55, %v296_v62  ;;  %1000 = vmatmul.msk.f32.gmra.mxu0 %vm104_vm1, %v229_v61 }
 0x316   :  { %v301_v0 = vmul.f32 1.442695, %v298_v63 }
 0x318   :  { %1057 = vpow2.f32 %v301_v0 }
 0x31b   :  { %v336_v1 = vpop.f32.mrf.mxu3 }
 0x31c   :  { %997 = vmatmul.msk.f32.vlgmr.msra.gmra.mxu2 %vm104_vm1, %v336_v1 }
 0x31e   :  { %v1058_v2 = vpop.eup %1057 }
 0x31f   :  { %v306_v3 = vsel %vm104_vm1, %v1058_v2, 0.0 }
 0x320   :  { %307 = vadd.xlane.f32.xlu2 %v306_v3 }
 0x323   :  { %v449_v6 = vpop.f32.mrf.mxu3 }
 0x324   :  { %v480_v7 = vmul.f32 0.35355338, %v449_v6 }
 0x326   :  { %v482_v9 = vsel %vm104_vm1, %v480_v7, -inf }
 0x327   :  { %483 = vmax.xlane.f32.xlu0 %v482_v9 }
 0x32b   :  { %v340_v11 = vpop.permute.xlu1 %339 }
 0x32c   :  { %360 = vmatpush.msrb.mxu1 %v340_v11 }
 0x32e   :  { %1003 = vmatpush.xpose.msk.msra.mxu1 %vm104_vm1, %v455_v12 }
 0x333   :  { %v505_v13 = vpop.permute.xlu1 %504 }
 0x334   :  { %525 = vmatpush.msra.mxu3 %v505_v13 }
 0x338   :  { %452 = vrot.lane.b32.xlu2 %v1258_v10, %s1148_s28 }
 0x33b   :  { %v619_v14 = vpop.permute.xlu1 %618  ;;  %590 = vrot.lane.b32.xlu0 %v1254_v8, %s1150_s15 }
 0x33c   :  { %1011 = vmatpush.xpose.msk.msrb.mxu3 %vm104_vm1, %v619_v14 }
 0x343   :  { %v617_v32 = vpop.permute.xlu1 %616 }
 0x383   :  { %v1333_v37 = vpop.f32.mrf.mxu0 }
 0x391   :  { %v1335_v39 = vpop.f32.mrf.mxu0 }
 0x393   :  { %v308_v15 = vpop.xlane.xlu2 %307 }
 0x394   :  { %1059 = vrcp.f32 %v308_v15 }
 0x39a   :  { %v1060_v16 = vpop.eup %1059  ;;  %v484_v17 = vpop.xlane.xlu0 %483 }
 0x39b   :  { %v488_v18 = vsub.f32 %v480_v7, %v484_v17  ;;  %v312_v19 = vmul.f32 %v1060_v16, %v1058_v2  ;;  %v453_v21 = vpop.permute.xlu2 %452 }
 0x39d   :  { %v490_v20 = vmul.f32 1.442695, %v488_v18  ;;  %996 = vmatmul.msk.f32.vlgmr.msrb.gmra.mxu1 %vm104_vm1, %v312_v19  ;;  %v1038_v18 = vld [vmem:[%s1449_s4] ss:$0 sm:$0xff] }
 0x39f   :  { %1061 = vpow2.f32 %v490_v20  ;;  %v389_v13 = vpop.f32.mrf.mxu2 }
 0x3a0   :  { %v419_v16 = vadd.f32 %v1333_v37, %v389_v13 }
 0x3a5   :  { %v1062_v22 = vpop.eup %1061  ;;  %1004 = vmatmul.msk.f32.vlgmr.msra.gmra.mxu1 %vm104_vm1, %v453_v21 }
 0x3a6   :  { %v494_v23 = vsel %vm104_vm1, %v1062_v22, 0.0 }
 0x3a7   :  { %495 = vadd.xlane.f32.xlu0 %v494_v23 }
 0x3ad   :  { %v591_v24 = vpop.permute.xlu0 %590 }
 0x3ae   :  { %1009 = vmatpush.xpose.msk.msrb.mxu0 %vm104_vm1, %v591_v24 }
 0x3bb   :  { %588 = vrot.lane.b32.xlu0 %v1254_v8, %s1151_s16 }
 0x41a   :  { %v362_v25 = vpop.f32.mrf.mxu1  ;;  %v496_v26 = vpop.xlane.xlu0 %495 }
 0x41b   :  { %1063 = vrcp.f32 %v496_v26  ;;  %998 = vmatmul.msk.f32.gmra.mxu2 %vm104_vm1, %v362_v25 }
 0x421   :  { %v1064_v27 = vpop.eup %1063 }
 0x422   :  { %v502_v28 = vmul.f32 %v1064_v27, %v1062_v22  ;;  %v477_v29 = vpop.f32.mrf.mxu1 }
 0x423   :  { %v481_v30 = vmul.f32 0.35355338, %v477_v29 }
 0x424   :  { %1005 = vmatmul.msk.f32.vlgmr.msra.gmra.mxu3 %vm104_vm1, %v502_v28 }
 0x425   :  { %v485_v31 = vsel %vm104_vm1, %v481_v30, -inf }
 0x426   :  { %486 = vmax.xlane.f32.xlu2 %v485_v31 }
 0x42c   :  { %1012 = vmatmul.msk.f32.vlgmr.msrb.gmra.mxu3 %vm104_vm1, %v617_v32  ;;  %v1153_v32 = vmov 32.0  }
 0x42d   :  { %v589_v33 = vpop.permute.xlu0 %588 }
 0x42e   :  { %1010 = vmatmul.msk.f32.vlgmr.msrb.gmra.mxu0 %vm104_vm1, %v589_v33 }
 0x499   :  { %v487_v35 = vpop.xlane.xlu2 %486 }
 0x49a   :  { %v489_v36 = vsub.f32 %v481_v30, %v487_v35 }
 0x49c   :  { %v492_v38 = vmul.f32 1.442695, %v489_v36 }
 0x49e   :  { %1065 = vpow2.f32 %v492_v38  ;;  %v392_v14 = vpop.f32.mrf.mxu2 }
 0x49f   :  { %v422_v23 = vadd.f32 %v1335_v39, %v392_v14 }
 0x4a4   :  { %v1066_v40 = vpop.eup %1065 }
 0x4a5   :  { %v497_v41 = vsel %vm104_vm1, %v1066_v40, 0.0 }
 0x4a6   :  { %498 = vadd.xlane.f32.xlu2 %v497_v41 }
 0x4a7   :  { %v527_v42 = vpop.f32.mrf.mxu3 }
 0x4a8   :  { %1007 = vmatmul.msk.f32.vlgmr.msrb.gmra.mxu2 %vm104_vm1, %v527_v42 }
 0x4ab   :  { %v613_v43 = vpop.f32.mrf.mxu0 }
 0x4ac   :  { %v644_v44 = vmul.f32 0.35355338, %v613_v43 }
 0x4ae   :  { %v646_v45 = vsel %vm104_vm1, %v644_v44, -inf }
 0x4af   :  { %v641_v46 = vpop.f32.mrf.mxu3  ;;  %647 = vmax.xlane.f32.xlu0 %v646_v45 }
 0x4b0   :  { %v645_v47 = vmul.f32 0.35355338, %v641_v46 }
 0x4b2   :  { %v649_v48 = vsel %vm104_vm1, %v645_v47, -inf }
 0x4b3   :  { %650 = vmax.xlane.f32.xlu1 %v649_v48  ;;  %v825_v48 = vld [vmem:[%s1452_s7 + $0x10] sm:$0xff] }
 0x4cc   :  { %530 = vrot.lane.b32.xlu1 %v1258_v10, %s1149_s29 }
 0x519   :  { %v499_v58 = vpop.xlane.xlu2 %498 }
 0x522   :  { %v648_v49 = vpop.xlane.xlu0 %647 }
 0x523   :  { %v652_v50 = vsub.f32 %v644_v44, %v648_v49  ;;  %v824_v49 = vld [vmem:[%s1452_s7 + $0x8] sm:$0xff] }
 0x525   :  { %v654_v51 = vmul.f32 1.442695, %v652_v50  ;;  %v823_v50 = vld [vmem:[%s1452_s7] sm:$0xff] }
 0x526   :  { %v651_v52 = vpop.xlane.xlu1 %650 }
 0x527   :  { %1067 = vpow2.f32 %v654_v51  ;;  %v653_v53 = vsub.f32 %v645_v47, %v651_v52  ;;  %v826_v47 = vld [vmem:[%s1452_s7 + $0x18] sm:$0xff] }
 0x529   :  { %v656_v54 = vmul.f32 1.442695, %v653_v53 }
 0x52b   :  { %1069 = vpow2.f32 %v656_v54  ;;  %v580_v15 = vpop.f32.mrf.mxu2  ;;  %v869_v54 = vld [vmem:[%s1454_s9 + $0x38] sm:$0xff] }
 0x52c   :  { %1071 = vrcp.f32 %v499_v58  ;;  %v586_v17 = vadd.f32 %v580_v15, %v419_v16  ;;  %889 = vmatpush.msra.mxu2 %v869_v54 }
 0x52d   :  { %v1068_v55 = vpop.eup %1067 }
 0x52e   :  { %v658_v56 = vsel %vm104_vm1, %v1068_v55, 0.0 }
 0x52f   :  { %659 = vadd.xlane.f32.xlu0 %v658_v56  ;;  %v867_v56 = vld [vmem:[%s1454_s9 + $0x28] sm:$0xff] }
 0x531   :  { %v1070_v57 = vpop.eup %1069 }
 0x532   :  { %v661_v59 = vsel %vm104_vm1, %v1070_v57, 0.0  ;;  %v1072_v60 = vpop.eup %1071 }
 0x533   :  { %662 = vadd.xlane.f32.xlu2 %v661_v59  ;;  %v503_v61 = vmul.f32 %v1072_v60, %v1066_v40  ;;  %v866_v59 = vld [vmem:[%s1454_s9 + $0x20] sm:$0xff] }
 0x53e   :  { %v531_v62 = vpop.permute.xlu1 %530 }
 0x53f   :  { %551 = vmatpush.msrb.mxu1 %v531_v62  ;;  %v865_v62 = vld [vmem:[%s1454_s9 + $0x18] sm:$0xff] }
 0x540   :  { %1006 = vmatmul.msk.f32.vlgmr.msrb.gmra.mxu1 %vm104_vm1, %v503_v61 }
 0x543   :  { %668 = vrot.lane.b32.xlu0 %v1254_v8, %s1152_s22  ;;  %v720_v8 = vld [vmem:[%s1448_s3 + $0x18] sm:$0xff] }
 0x544   :  { %742 = vmatpush.msra.mxu3 %v720_v8 }
 0x54b   :  { %694 = vrot.lane.b32.xlu2 %v1258_v10, %s1152_s22 }
 0x5a2   :  { %v660_v0 = vpop.xlane.xlu0 %659 }
 0x5a6   :  { %v663_v63 = vpop.xlane.xlu2 %662 }
 0x5a7   :  { %1073 = vrcp.f32 %v663_v63 }
 0x5a8   :  { %1075 = vrcp.f32 %v660_v0 }
 0x5a9   :  { %1077 = vrcp.f32 %v1153_v32  ;;  %v1042_v32 = vld [vmem:[%s1455_s10] ss:$0 sm:$0xff] }
 0x5ad   :  { %v1074_v1 = vpop.eup %1073 }
 0x5ae   :  { %v667_v2 = vmul.f32 %v1074_v1, %v1070_v57  ;;  %v695_v3 = vpop.permute.xlu2 %694  ;;  %v1076_v6 = vpop.eup %1075 }
 0x5af   :  { %715 = vmatpush.msra.mxu0 %v695_v3  ;;  %v666_v7 = vmul.f32 %v1076_v6, %v1068_v55  ;;  %v1078_v33 = vpop.eup %1077  ;;  %v868_v55 = vld [vmem:[%s1454_s9 + $0x30] sm:$0xff] }
 0x5b0   :  { %1014 = vmatmul.msk.f32.vlgmr.msra.gmra.mxu0 %vm104_vm1, %v667_v2  ;;  %v767_v34 = vmul.f32 32.0, %v1078_v33  ;;  %vm771_vm2 = vweird.f32 %v1078_v33  ;;  %890 = vmatpush.msra.mxu2 %v868_v55 }
 0x5b2   :  { %v768_v35 = vsub.f32 1.0, %v767_v34  ;;  %891 = vmatpush.msra.mxu2 %v867_v56 }
 0x5b4   :  { %v769_v36 = vmul.f32 %v1078_v33, %v768_v35  ;;  %892 = vmatpush.msra.mxu2 %v866_v59 }
 0x5b5   :  { %v669_v9 = vpop.permute.xlu0 %668 }
 0x5b6   :  { %689 = vmatpush.msra.mxu1 %v669_v9  ;;  %v770_v37 = vadd.f32 %v1078_v33, %v769_v36  ;;  %893 = vmatpush.msra.mxu2 %v865_v62  ;;  %v1039_v9 = vld [vmem:[%s1450_s5] ss:$0 sm:$0xff] }
 0x5b7   :  { %1013 = vmatmul.msk.f32.vlgmr.msra.gmra.mxu1 %vm104_vm1, %v666_v7 }
 0x5b8   :  { %849 = vmatpush.msrb.mxu1 %v826_v47 }
 0x5ba   :  { %850 = vmatpush.msrb.mxu1 %v825_v48 }
 0x5bc   :  { %851 = vmatpush.msrb.mxu1 %v824_v49 }
 0x5bd   :  { %v553_v11 = vpop.f32.mrf.mxu1 }
 0x5be   :  { %1008 = vmatmul.msk.f32.gmra.mxu2 %vm104_vm1, %v553_v11  ;;  %852 = vmatpush.msrb.mxu1 %v823_v50 }
 0x62d   :  { %v717_v12 = vpop.f32.mrf.mxu0 }
 0x634   :  { %v691_v10 = vpop.f32.mrf.mxu1 }
 0x635   :  { %1015 = vmatmul.msk.f32.vlgmr.msra.gmra.mxu3 %vm104_vm1, %v691_v10 }
 0x63d   :  { %1016 = vmatmul.msk.f32.gmra.mxu3 %vm104_vm1, %v717_v12  ;;  %v1040_v12 = vld [vmem:[%s1451_s6] ss:$0 sm:$0xff] }
 0x641   :  { %v583_v22 = vpop.f32.mrf.mxu2 }
 0x642   :  { %v587_v25 = vadd.f32 %v583_v22, %v422_v23  ;;  %v864_v22 = vld [vmem:[%s1454_s9 + $0x10] sm:$0xff]  ;;  %v863_v23 = vld [vmem:[%s1454_s9 + $0x8] sm:$0xff] }
 0x643   :  { %894 = vmatpush.msra.mxu2 %v864_v22 }
 0x645   :  { %895 = vmatpush.msra.mxu2 %v863_v23 }
 0x6b8   :  { %v744_v19 = vpop.f32.mrf.mxu3 }
 0x6b9   :  { %v750_v20 = vadd.f32 %v744_v19, %v586_v17 }
 0x6bb   :  { %v756_v21 = vadd.f32 %v1038_v18, %v750_v20 }
 0x6bd   :  { %v758_v24 = vadd.f32 %v756_v21, %v1243_v4  ;;  %v1365_v4 = vsel %vm771_vm2, %v1078_v33, %v770_v37 }
 0x6bf   :  { %v760_v26 = vsel %vm71_vm0, %v758_v24, 0.0 }
 0x6c0   :  { %761 = vadd.xlane.f32.xlu1 %v760_v26  ;;  %v747_v27 = vpop.f32.mrf.mxu3 }
 0x6c1   :  { %v751_v28 = vadd.f32 %v747_v27, %v587_v25  ;;  %v1041_v25 = vld [vmem:[%s1453_s8] ss:$0 sm:$0xff] }
 0x6c3   :  { %v757_v29 = vadd.f32 %v1038_v18, %v751_v28 }
 0x6c5   :  { %v759_v30 = vadd.f32 %v757_v29, %v1247_v5 }
 0x6c7   :  { %v763_v31 = vsel %vm71_vm0, %v759_v30, 0.0 }
 0x6c8   :  { %764 = vadd.xlane.f32.xlu0 %v763_v31 }
 0x733   :  { %v762_v38 = vpop.xlane.xlu1 %761 }
 0x734   :  { %v773_v39 = vmul.f32 %v1365_v4, %v762_v38 }
 0x736   :  { %v775_v40 = vsub.f32 %v758_v24, %v773_v39  ;;  %v862_v24 = vld [vmem:[%s1454_s9] sm:$0xff] }
 0x737   :  { %896 = vmatpush.msra.mxu2 %v862_v24 }
 0x738   :  { %v777_v41 = vmul.f32 %v775_v40, %v775_v40 }
 0x73a   :  { %v779_v5 = vsel %vm71_vm0, %v777_v41, 0.0 }
 0x73b   :  { %780 = vadd.xlane.f32.xlu2 %v779_v5  ;;  %v765_v42 = vpop.xlane.xlu0 %764 }
 0x73c   :  { %v774_v43 = vmul.f32 %v1365_v4, %v765_v42 }
 0x73e   :  { %v776_v44 = vsub.f32 %v759_v30, %v774_v43 }
 0x740   :  { %v778_v45 = vmul.f32 %v776_v44, %v776_v44 }
 0x742   :  { %v782_v46 = vsel %vm71_vm0, %v778_v45, 0.0 }
 0x743   :  { %783 = vadd.xlane.f32.xlu1 %v782_v46 }
 0x7ae   :  { %v781_v51 = vpop.xlane.xlu2 %780 }
 0x7af   :  { %v785_v52 = vmul.f32 %v781_v51, %v1365_v4 }
 0x7b1   :  { %v787_v53 = vadd.f32 1e-05, %v785_v52 }
 0x7b3   :  { %1079 = vrsqrt.f32 %v787_v53  ;;  %vm795_vm4 = vweird.f32 %v787_v53 }
 0x7b6   :  { %v784_v57 = vpop.xlane.xlu1 %783 }
 0x7b7   :  { %v786_v58 = vmul.f32 %v784_v57, %v1365_v4 }
 0x7b9   :  { %v1080_v60 = vpop.eup %1079  ;;  %v788_v61 = vadd.f32 1e-05, %v786_v58 }
 0x7ba   :  { %v790_v63 = vmul.f32 %v1080_v60, %v787_v53  ;;  %vm796_vm3 = vweird.f32 %v1080_v60 }
 0x7bb   :  { %1081 = vrsqrt.f32 %v788_v61  ;;  %vm797_vm5 = vmor %vm795_vm4, %vm796_vm3  ;;  %vm805_vm7 = vweird.f32 %v788_v61 }
 0x7bc   :  { %v791_v0 = vmul.f32 %v1080_v60, %v790_v63 }
 0x7be   :  { %v792_v1 = vmul.f32 0.5, %v791_v0  ;;  %v1043_v0 = vld [vmem:[%s1456_s11] ss:$0 sm:$0xff]  ;;  %s1154_s11 = smov [#allocation5]  }
 0x7bf   :  { %s968_s18 = sshll.u32 %s1154_s11, 4  ;;  %s969_s18 = int_to_ptr.vmem [resolvable:$true] %s968_s18 }
 0x7c0   :  { %v793_v2 = vsub.f32 1.5, %v792_v1 }
 0x7c1   :  { %v1082_v3 = vpop.eup %1081 }
 0x7c2   :  { %v794_v6 = vmul.f32 %v1080_v60, %v793_v2  ;;  %v800_v7 = vmul.f32 %v1082_v3, %v788_v61  ;;  %vm806_vm6 = vweird.f32 %v1082_v3 }
 0x7c3   :  { %vm807_vm8 = vmor %vm805_vm7, %vm806_vm6 }
 0x7c4   :  { %v798_v11 = vsel %vm797_vm5, %v1080_v60, %v794_v6  ;;  %v801_v8 = vmul.f32 %v1082_v3, %v800_v7 }
 0x7c5   :  { %v809_v10 = vmul.f32 %v798_v11, %v775_v40 }
 0x7c6   :  { %v802_v13 = vmul.f32 0.5, %v801_v8 }
 0x7c7   :  { %v815_v14 = vmul.f32 %v1039_v9, %v809_v10 }
 0x7c8   :  { %v803_v15 = vsub.f32 1.5, %v802_v13 }
 0x7c9   :  { %v821_v16 = vadd.f32 %v1040_v12, %v815_v14 }
 0x7ca   :  { %v804_v17 = vmul.f32 %v1082_v3, %v803_v15 }
 0x7cb   :  { %1017 = vmatmul.msk.f32.vlgmr.msrb.gmra.mxu1 %vm71_vm0, %v821_v16 }
 0x7cc   :  { %v808_v18 = vsel %vm807_vm8, %v1082_v3, %v804_v17  ;;  %v1044_v3 = vld [vmem:[%s1457_s12] ss:$0 sm:$0xff] }
 0x7cd   :  { %v810_v19 = vmul.f32 %v808_v18, %v776_v44 }
 0x7cf   :  { %v816_v20 = vmul.f32 %v1039_v9, %v810_v19 }
 0x7d1   :  { %v822_v21 = vadd.f32 %v1040_v12, %v816_v20 }
 0x7d3   :  { %1018 = vmatmul.msk.f32.gmra.mxu1 %vm71_vm0, %v822_v21 }
 0x848   :  { %v854_v26 = vpop.f32.mrf.mxu1 }
 0x849   :  { %v855_v27 = vadd.f32 %v1041_v25, %v854_v26 }
 0x84b   :  { %v860_v28 = vmax.f32 %v855_v27, 0.0 }
 0x84d   :  { %1019 = vmatmul.msk.f32.vlgmr.msra.gmra.mxu2 %vm874_vm9, %v860_v28 }
 0x850   :  { %v857_v29 = vpop.f32.mrf.mxu1 }
 0x851   :  { %v858_v30 = vadd.f32 %v1041_v25, %v857_v29 }
 0x853   :  { %v861_v31 = vmax.f32 %v858_v30, 0.0 }
 0x855   :  { %1020 = vmatmul.msk.f32.gmra.mxu2 %vm874_vm9, %v861_v31 }
 0x8d0   :  { %v898_v33 = vpop.f32.mrf.mxu2 }
 0x8d1   :  { %v899_v34 = vadd.f32 %v1042_v32, %v898_v33 }
 0x8d3   :  { %v904_v35 = vadd.f32 %v899_v34, %v821_v16 }
 0x8d5   :  { %v906_v36 = vsel %vm71_vm0, %v904_v35, 0.0 }
 0x8d6   :  { %907 = vadd.xlane.f32.xlu0 %v906_v36 }
 0x8d8   :  { %v901_v37 = vpop.f32.mrf.mxu2 }
 0x8d9   :  { %v902_v38 = vadd.f32 %v1042_v32, %v901_v37 }
 0x8db   :  { %v905_v39 = vadd.f32 %v902_v38, %v822_v21 }
 0x8dd   :  { %v909_v40 = vsel %vm71_vm0, %v905_v39, 0.0 }
 0x8de   :  { %910 = vadd.xlane.f32.xlu1 %v909_v40 }
 0x949   :  { %v908_v41 = vpop.xlane.xlu0 %907 }
 0x94a   :  { %v912_v5 = vmul.f32 %v908_v41, %v1365_v4 }
 0x94c   :  { %v914_v42 = vsub.f32 %v904_v35, %v912_v5 }
 0x94e   :  { %v916_v43 = vmul.f32 %v914_v42, %v914_v42 }
 0x950   :  { %v918_v44 = vsel %vm71_vm0, %v916_v43, 0.0 }
 0x951   :  { %v911_v45 = vpop.xlane.xlu1 %910  ;;  %919 = vadd.xlane.f32.xlu0 %v918_v44 }
 0x952   :  { %v913_v46 = vmul.f32 %v911_v45, %v1365_v4 }
 0x954   :  { %v915_v47 = vsub.f32 %v905_v39, %v913_v46 }
 0x956   :  { %v917_v48 = vmul.f32 %v915_v47, %v915_v47 }
 0x958   :  { %v921_v49 = vsel %vm71_vm0, %v917_v48, 0.0 }
 0x959   :  { %922 = vadd.xlane.f32.xlu2 %v921_v49 }
 0x9c4   :  { %v920_v50 = vpop.xlane.xlu0 %919 }
 0x9c5   :  { %v924_v51 = vmul.f32 %v920_v50, %v1365_v4 }
 0x9c7   :  { %v926_v52 = vadd.f32 1e-05, %v924_v51 }
 0x9c9   :  { %1083 = vrsqrt.f32 %v926_v52  ;;  %vm934_vm11 = vweird.f32 %v926_v52 }
 0x9cc   :  { %v923_v53 = vpop.xlane.xlu2 %922 }
 0x9cd   :  { %v925_v54 = vmul.f32 %v923_v53, %v1365_v4 }
 0x9cf   :  { %v1084_v55 = vpop.eup %1083  ;;  %v927_v56 = vadd.f32 1e-05, %v925_v54 }
 0x9d0   :  { %v929_v57 = vmul.f32 %v1084_v55, %v926_v52  ;;  %vm935_vm10 = vweird.f32 %v1084_v55 }
 0x9d1   :  { %1085 = vrsqrt.f32 %v927_v56  ;;  %vm936_vm12 = vmor %vm934_vm11, %vm935_vm10  ;;  %vm944_vm14 = vweird.f32 %v927_v56 }
 0x9d2   :  { %v930_v58 = vmul.f32 %v1084_v55, %v929_v57 }
 0x9d4   :  { %v931_v59 = vmul.f32 0.5, %v930_v58 }
 0x9d6   :  { %v932_v60 = vsub.f32 1.5, %v931_v59 }
 0x9d7   :  { %v1086_v61 = vpop.eup %1085 }
 0x9d8   :  { %v933_v62 = vmul.f32 %v1084_v55, %v932_v60  ;;  %v939_v63 = vmul.f32 %v1086_v61, %v927_v56  ;;  %vm945_vm13 = vweird.f32 %v1086_v61 }
 0x9d9   :  { %vm946_vm15 = vmor %vm944_vm14, %vm945_vm13 }
 0x9da   :  { %v937_v1 = vsel %vm936_vm12, %v1084_v55, %v933_v62  ;;  %v940_v2 = vmul.f32 %v1086_v61, %v939_v63 }
 0x9db   :  { %v948_v4 = vmul.f32 %v937_v1, %v914_v42 }
 0x9dc   :  { %v941_v6 = vmul.f32 0.5, %v940_v2 }
 0x9dd   :  { %v954_v7 = vmul.f32 %v1043_v0, %v948_v4 }
 0x9de   :  { %v942_v9 = vsub.f32 1.5, %v941_v6 }
 0x9df   :  { %v960_v11 = vadd.f32 %v1044_v3, %v954_v7 }
 0x9e0   :  { %v943_v8 = vmul.f32 %v1086_v61, %v942_v9 }
 0x9e1   :  { %962 = vst.msk [vmem:[#allocation5] sm:$0xff] %vm71_vm0, %v960_v11 }
 0x9e2   :  { %v947_v10 = vsel %vm946_vm15, %v1086_v61, %v943_v8 }
 0x9e3   :  { %v949_v12 = vmul.f32 %v947_v10, %v915_v47 }
 0x9e5   :  { %v955_v13 = vmul.f32 %v1043_v0, %v949_v12 }
 0x9e7   :  { %v961_v14 = vadd.f32 %v1044_v3, %v955_v13 }
 0x9e9   :  { %963 = vst.msk [vmem:[#allocation5 + $0x8] sm:$0xff] %vm71_vm0, %v961_v14 }
 0x9ea   :  { %976 = dma.vmem_to_hbm [thread:$0]  %s969_s18, 256, %s971_s20, [#allocation4], %s1140_s30, %s1140_s30, %s1141_s14  }
 0x9eb   :  { %1137 = dma.done.wait [#allocation4], 256  }
 0x9ec   :  { %1138 = vsyncadd [#allocation4], 4294967040 }
 0x9ed   :  { %981 = vsyncpa [#allocation3], 1 }
 0x9ee   :  { %982 = vsyncpa [#allocation4], 1 }

</bundles_post_ra>
